<compile_context>
chip_gen: v7x
topology: tpu7x:2x2x1
jax: 0.10.0
libtpu: 0.0.40
codegen_flags: <defaults>
</compile_context>

<pallas_src>
import functools

import jax
import jax.numpy as jnp
from jax.experimental import pallas as pl
from jax.experimental.pallas import tpu as pltpu


# ---------------------------------------------------------------------------
# Kernels
# ---------------------------------------------------------------------------

def _stats_kernel(x_ref, s_ref, *, c_in):
    """Accumulate per-channel partial sum / sum-of-squares over depth blocks.

    x_ref: (1, C_in, Dblk, HWp) VMEM input block.
    s_ref: (1, 2*C_in, HWp)     VMEM output block, resident across the depth grid
           axis (index_map independent of it); rows [0:C_in] = sum, rows
           [C_in:2*C_in] = sum of squares.  Lanes are reduced later in JAX.
    """
    @pl.when(pl.program_id(1) == 0)
    def _():
        s_ref[...] = jnp.zeros_like(s_ref)

    for ci in range(c_in):
        v = x_ref[0, ci].astype(jnp.float32)                       # (Dblk, HWp)
        s_ref[0, ci:ci + 1, :] += jnp.sum(v, axis=0, keepdims=True)
        s_ref[0, c_in + ci:c_in + ci + 1, :] += jnp.sum(v * v, axis=0,
                                                        keepdims=True)


def _upscale_kernel(scale_ref, shift_ref, w_ref, b_ref, x_ref, o_ref, *,
                    c_in, c_out, kd_total, hw, apply_affine, use_relu):
    """(optional BN affine + ReLU) + transposed-conv as VPU broadcast FMAs.

    scale_ref, shift_ref : (C_in,)            SMEM (unused when BN is folded)
    w_ref                : (C_in*kD*C_out,)   SMEM, index (ci*kD + kd)*C_out + co
    b_ref                : (kD*C_out,)        SMEM, index kd*C_out + co
    x_ref                : (1, C_in, Dblk, HWp)        VMEM block
    o_ref                : (1, C_out, Dblk, kD*HWp)    VMEM block (lane-dense)
    """
    # Load (and optionally normalize/activate) each input channel once.
    xc = []
    for ci in range(c_in):
        v = x_ref[0, ci].astype(jnp.float32)                       # (Dblk, HWp)
        if apply_affine:
            v = v * scale_ref[ci] + shift_ref[ci]
        if use_relu:
            v = jnp.maximum(v, 0.0)
        xc.append(v)
    # Each (co, kd) output slab is C_in broadcast multiply-adds on lane-dense tiles.
    # Store offsets kd*hw are static multiples of 128 -> unmasked lane-dense stores.
    # TODO(synk): for C_in >~ 8 move this contraction onto the MXU (jnp.dot with
    # K=C_in) and/or keep the FMA chain in bf16 on v6e/v7x; on v7x the VPU (not HBM)
    # becomes the binding slot for this broadcast-FMA formulation at larger C_in.
    for co in range(c_out):
        for kd in range(kd_total):
            acc = xc[0] * w_ref[kd * c_out + co]
            for ci in range(1, c_in):
                acc = acc + xc[ci] * w_ref[(ci * kd_total + kd) * c_out + co]
            acc = acc + b_ref[kd * c_out + co]
            o_ref[0, co, :, kd * hw:(kd + 1) * hw] = acc.astype(o_ref.dtype)


# ---------------------------------------------------------------------------
# VMEM budgeting / depth blocking
# ---------------------------------------------------------------------------

def _physical_vmem_bytes():
    """Physical VMEM of the attached TPU generation (conservative fallbacks)."""
    try:
        return int(pltpu.get_tpu_info().vmem_capacity_bytes)
    except Exception:
        pass
    try:
        kind = jax.devices()[0].device_kind.lower()
    except Exception:
        kind = ""
    if "v7" in kind:
        return 64 << 20            # v7x: 64 MiB per TensorCore
    return 128 << 20               # v5e / v6e


def _vmem_limit_bytes():
    """Scoped-VMEM limit granted to the compiler: ~75% of physical, capped at 96 MiB.

    -> ~96 MiB on v5e/v6e (128 MiB physical), ~48 MiB on v7x (64 MiB physical).
    """
    return min((_physical_vmem_bytes() * 3) // 4, 96 << 20)


def _choose_depth_blocking(d_total, bytes_per_depth, budget_bytes, min_blocks=1):
    """Depth blocking that always respects `budget_bytes` (zero-padding D if needed).

    Returns (dblk, d_pad, n_blocks).  A single block may cover the full (unaligned)
    depth; multiple blocks are sublane-aligned (multiples of 8).
    """
    cap_rows = max(1, budget_bytes // max(1, bytes_per_depth))
    want_rows = min(d_total, cap_rows, pl.cdiv(d_total, max(1, min_blocks)))
    if want_rows >= d_total and min_blocks <= 1:
        return d_total, d_total, 1                 # single full-depth block
    dblk = max(8, (want_rows // 8) * 8)            # sublane-aligned block
    if dblk >= d_total:
        return d_total, d_total, 1                 # too shallow to split usefully
    n_blocks = pl.cdiv(d_total, dblk)
    # Re-balance to minimize depth padding while keeping sublane alignment.
    dblk = ((pl.cdiv(d_total, n_blocks) + 7) // 8) * 8
    n_blocks = pl.cdiv(d_total, dblk)
    return dblk, dblk * n_blocks, n_blocks


def _choose_stats_depth_block(d_pad, dblk_conv, n_db_conv, bytes_per_depth,
                              fixed_bytes, budget_bytes, min_blocks=1):
    """Stats-pass depth block: a multiple of the conv block (so both passes share the
    same padded depth) that fits the much smaller stats footprint."""
    cap_rows = max(1, (budget_bytes - fixed_bytes) // max(1, bytes_per_depth))
    max_k = max(1, n_db_conv // max(1, min_blocks))
    for k in range(max_k, 0, -1):
        cand = dblk_conv * k
        if cand <= cap_rows and d_pad % cand == 0:
            return cand, d_pad // cand
    return dblk_conv, n_db_conv


# ---------------------------------------------------------------------------
# Wrapper
# ---------------------------------------------------------------------------

def upscale_forward(x, gamma, beta, weight, bias, *, activation=None, eps=1e-5):
    """x: (N, C_in, D, H, W) float32 (NCDHW, as PyTorch).
    weight: (C_in, C_out, kD, 1, 1)  (PyTorch ConvTranspose3d layout), stride == kD.
    bias:   (C_out,).   gamma/beta: (C_in,) BatchNorm affine params.
    Returns (N, C_out, kD*D, H, W)."""
    N, C_in, D, H, W = x.shape
    C_in_w, C_out, kD, kH, kW = weight.shape
    assert C_in_w == C_in and kH == 1 and kW == 1
    HW = H * W
    m_total = float(N * D * HW)
    itemsize = jnp.dtype(x.dtype).itemsize

    # Lane padding: keep every per-(co,kd) store slab a lane-aligned multiple of 128.
    HWp = ((HW + 127) // 128) * 128

    # Generation-aware VMEM budget.
    vmem_limit = _vmem_limit_bytes()
    budget = max(4 << 20, (vmem_limit * 9) // 10)

    # Conv-pass footprint per depth row: double-buffered input + double-buffered
    # output + C_in single-buffered f32 normalized-channel temporaries.
    bpd_conv = (2 * C_in * HWp * itemsize
                + 2 * C_out * kD * HWp * itemsize
                + C_in * HWp * 4)
    min_blocks = 1 if N >= 2 else 2          # >=2 total grid steps for v7x megacore
    dblk, D_pad, n_db = _choose_depth_blocking(D, bpd_conv, budget, min_blocks)

    # Stats pass: its own (larger) depth block; tiny resident accumulator output.
    bpd_stats = 2 * C_in * HWp * itemsize + 2 * HWp * 4
    fixed_stats = 2 * 2 * C_in * HWp * 4
    dblk_s, n_db_s = _choose_stats_depth_block(D_pad, dblk, n_db, bpd_stats,
                                               fixed_stats, budget, min_blocks)

    # Free reshape (merge H,W into the lane axis) + zero padding.  Zero padding keeps
    # the batch statistics exact (zeros contribute 0 to sum / sum-of-squares, and we
    # divide by the true element count); padded conv outputs are sliced off below.
    x4 = x.reshape(N, C_in, D, HW)
    if D_pad != D or HWp != HW:
        x4 = jnp.pad(x4, ((0, 0), (0, 0), (0, D_pad - D), (0, HWp - HW)))

    cparams_stats = pltpu.CompilerParams(
        dimension_semantics=("parallel", "arbitrary"),
        vmem_limit_bytes=vmem_limit)
    cparams_conv = pltpu.CompilerParams(
        dimension_semantics=("parallel", "parallel"),
        vmem_limit_bytes=vmem_limit)

    # ---- pass 1: per-channel partial statistics, accumulated over depth ----
    partial = pl.pallas_call(
        functools.partial(_stats_kernel, c_in=C_in),
        out_shape=jax.ShapeDtypeStruct((N, 2 * C_in, HWp), jnp.float32),
        grid=(N, n_db_s),
        in_specs=[pl.BlockSpec((1, C_in, dblk_s, HWp), lambda n, d: (n, 0, d, 0))],
        out_specs=pl.BlockSpec((1, 2 * C_in, HWp), lambda n, d: (n, 0, 0)),
        compiler_params=cparams_stats,
    )(x4)

    sums_all = jnp.sum(partial, axis=(0, 2))            # (2*C_in,) tiny JAX reduce
    mean = sums_all[:C_in] / m_total
    # NOTE: E[x^2] - E[x]^2 in f32 can cancel for large-mean inputs; clamp at 0.
    # TODO(synk): Welford / centered second pass for numerically hard inputs.
    var = jnp.maximum(sums_all[C_in:] / m_total - mean * mean, 0.0)
    scale = gamma.astype(jnp.float32) * jax.lax.rsqrt(var + eps)    # (C_in,)
    shift = beta.astype(jnp.float32) - mean * scale                 # (C_in,)

    # ---- fold BN into the conv weights/bias when there is no activation ----
    wk = weight[:, :, :, 0, 0].astype(jnp.float32)        # (C_in, C_out, kD)
    if activation is None:
        w_eff = wk * scale[:, None, None]
        b_eff = bias.astype(jnp.float32)[None, :] + jnp.einsum('c,cok->ko', shift, wk)
        scale_arg = jnp.ones((C_in,), jnp.float32)
        shift_arg = jnp.zeros((C_in,), jnp.float32)
        apply_affine, use_relu = False, False
    elif activation == "relu":
        w_eff = wk
        b_eff = jnp.tile(bias.astype(jnp.float32), kD).reshape(kD, C_out)
        scale_arg, shift_arg = scale, shift
        apply_affine, use_relu = True, True
    else:
        raise NotImplementedError(
            "only activation=None or 'relu' supported")  # TODO(synk): other activations
    w_flat = jnp.transpose(w_eff, (0, 2, 1)).reshape(-1)  # (C_in*kD*C_out,)
    b_flat = b_eff.reshape(-1)                            # (kD*C_out,)

    # ---- pass 2: (affine/ReLU) + transposed conv, lane-dense in/out ----
    # TODO(synk): fused single-pass (stats + conv from a resident VMEM copy of x)
    # variant when all of x fits the VMEM budget, so x is read from HBM only once.
    kern = functools.partial(_upscale_kernel, c_in=C_in, c_out=C_out, kd_total=kD,
                             hw=HWp, apply_affine=apply_affine, use_relu=use_relu)
    y4 = pl.pallas_call(
        kern,
        out_shape=jax.ShapeDtypeStruct((N, C_out, D_pad, kD * HWp), x.dtype),
        grid=(N, n_db),
        in_specs=[
            pl.BlockSpec(memory_space=pltpu.MemorySpace.SMEM),   # scale
            pl.BlockSpec(memory_space=pltpu.MemorySpace.SMEM),   # shift
            pl.BlockSpec(memory_space=pltpu.MemorySpace.SMEM),   # folded weights
            pl.BlockSpec(memory_space=pltpu.MemorySpace.SMEM),   # folded bias
            pl.BlockSpec((1, C_in, dblk, HWp), lambda n, d: (n, 0, d, 0)),
        ],
        out_specs=pl.BlockSpec((1, C_out, dblk, kD * HWp), lambda n, d: (n, 0, d, 0)),
        compiler_params=cparams_conv,
    )(scale_arg, shift_arg, w_flat, b_flat, x4)

    # Free reshapes: split kd out of the lane axis, strip padding, interleave kd
    # into depth (out_d = kD*d + kd).
    y5 = y4.reshape(N, C_out, D_pad, kD, HWp)
    if D_pad != D or HWp != HW:
        y5 = y5[:, :, :D, :, :HW]
    return y5.reshape(N, C_out, D * kD, H, W)


def upscale_reference(x, gamma, beta, weight, bias, *, activation=None, eps=1e-5):
    """Pure-JAX reference matching PyTorch training-mode forward."""
    mean = jnp.mean(x, axis=(0, 2, 3, 4), keepdims=True)
    var = jnp.mean((x - mean) ** 2, axis=(0, 2, 3, 4), keepdims=True)
    xn = (x - mean) * jax.lax.rsqrt(var + eps)
    xn = xn * gamma.reshape(1, -1, 1, 1, 1) + beta.reshape(1, -1, 1, 1, 1)
    if activation == "relu":
        xn = jnp.maximum(xn, 0.0)
    w = weight[:, :, :, 0, 0]                             # (C_in, C_out, kD)
    y = jnp.einsum('ncdhw,cok->nodkhw', xn, w)
    n, co, d, kd, h, wd = y.shape
    y = y.reshape(n, co, d * kd, h, wd) + bias.reshape(1, -1, 1, 1, 1)
    return y


if __name__ == "__main__":
    key = jax.random.PRNGKey(0)
    k1, k2, k3, k4, k5, k6, k7, k8 = jax.random.split(key, 8)

    up = 2

    # --- Case 1: default config (activation=None, BN folded into the conv) ---
    N, C_in, C_out, D, H, W = 2, 4, 8, 8, 16, 16
    x = jax.random.normal(k1, (N, C_in, D, H, W), jnp.float32)
    gamma = jnp.ones((C_in,), jnp.float32)      # BatchNorm3d default affine
    beta = jnp.zeros((C_in,), jnp.float32)
    weight = 0.1 * jax.random.normal(k2, (C_in, C_out, up, 1, 1), jnp.float32)
    bias = 0.1 * jax.random.normal(k3, (C_out,), jnp.float32)

    out = jax.block_until_ready(
        upscale_forward(x, gamma, beta, weight, bias, activation=None))
    ref = upscale_reference(x, gamma, beta, weight, bias, activation=None)
    assert out.shape == (N, C_out, up * D, H, W)
    assert bool(jnp.allclose(out, ref, atol=1e-4, rtol=1e-4))

    # --- Case 2: ReLU config (explicit BN affine + ReLU inside the kernel) ---
    out_r = jax.block_until_ready(
        upscale_forward(x, gamma, beta, weight, bias, activation="relu"))
    ref_r = upscale_reference(x, gamma, beta, weight, bias, activation="relu")
    assert bool(jnp.allclose(out_r, ref_r, atol=1e-4, rtol=1e-4))

    # --- Case 3: awkward shapes: exercises lane padding (H*W=100 -> 128),
    #     depth padding / multi-block depth grid, and the N==1 megacore split ---
    N2, C_in2, C_out2, D2, H2, W2 = 1, 3, 5, 20, 10, 10
    x2 = jax.random.normal(k4, (N2, C_in2, D2, H2, W2), jnp.float32)
    gamma2 = 1.0 + 0.1 * jax.random.normal(k5, (C_in2,), jnp.float32)
    beta2 = 0.1 * jax.random.normal(k6, (C_in2,), jnp.float32)
    weight2 = 0.1 * jax.random.normal(k7, (C_in2, C_out2, up, 1, 1), jnp.float32)
    bias2 = 0.1 * jax.random.normal(k8, (C_out2,), jnp.float32)

    out2 = jax.block_until_ready(
        upscale_forward(x2, gamma2, beta2, weight2, bias2, activation="relu"))
    ref2 = upscale_reference(x2, gamma2, beta2, weight2, bias2, activation="relu")
    assert out2.shape == (N2, C_out2, up * D2, H2, W2)
    assert bool(jnp.allclose(out2, ref2, atol=1e-4, rtol=1e-4))

    print("KERNEL_OK")
</pallas_src>

<mosaic_0001>
module attributes {stable_mosaic.version = 11 : i64} {
  func.func @_stats_kernel(%arg0: i32, %arg1: i32, %arg2: memref<1x4x8x256xf32, #tpu.memory_space<vmem>>, %arg3: memref<1x8x256xf32, #tpu.memory_space<vmem>>) attributes {dimension_semantics = [#tpu.dimension_semantics<parallel>, #tpu.dimension_semantics<arbitrary>], iteration_bounds = array<i64: 2, 1>, scalar_prefetch = 0 : i64, scratch_operands = 0 : i64, tpu.core_type = #tpu.core_type<tc>, window_params = [{transform_indices = @transform_0, window_bounds = array<i64: 1, 4, 8, 256>}, {transform_indices = @transform_1, window_bounds = array<i64: 1, 8, 256>}]} {
    %c0_i32 = arith.constant 0 : i32
    %0 = arith.cmpi eq, %arg1, %c0_i32 : i32
    %1 = arith.extui %0 : i1 to i32
    %c0_i32_0 = arith.constant 0 : i32
    %2 = arith.cmpi ne, %1, %c0_i32_0 : i32
    scf.if %2 {
      %cst_64 = arith.constant 0.000000e+00 : f32
      %79 = vector.broadcast %cst_64 : f32 to vector<1x8x256xf32>
      %c0_65 = arith.constant 0 : index
      %c0_66 = arith.constant 0 : index
      %c0_67 = arith.constant 0 : index
      %80 = vector.load %arg3[%c0_65, %c0_66, %c0_67] : memref<1x8x256xf32, #tpu.memory_space<vmem>>, vector<1x8x256xf32>
      tpu.vector_store %arg3[%c0_65, %c0_66, %c0_67], %79 {strides = array<i32>} : memref<1x8x256xf32, #tpu.memory_space<vmem>>, vector<1x8x256xf32>,
    } else {
    }
    %c0 = arith.constant 0 : index
    %c0_1 = arith.constant 0 : index
    %c0_2 = arith.constant 0 : index
    %c0_3 = arith.constant 0 : index
    %3 = vector.load %arg2[%c0, %c0_1, %c0_2, %c0_3] : memref<1x4x8x256xf32, #tpu.memory_space<vmem>>, vector<1x1x8x256xf32>
    %4 = vector.shape_cast %3 : vector<1x1x8x256xf32> to vector<8x256xf32>
    %c0_4 = arith.constant 0 : index
    %c0_5 = arith.constant 0 : index
    %c0_6 = arith.constant 0 : index
    %5 = vector.load %arg3[%c0_4, %c0_5, %c0_6] : memref<1x8x256xf32, #tpu.memory_space<vmem>>, vector<1x1x256xf32>
    %6 = vector.shape_cast %5 : vector<1x1x256xf32> to vector<1x256xf32>
    %cst = arith.constant dense<0.000000e+00> : vector<256xf32>
    %7 = vector.multi_reduction <add>, %4, %cst [0] : vector<8x256xf32> to vector<256xf32>
    %8 = vector.shape_cast %7 : vector<256xf32> to vector<1x256xf32>
    %9 = arith.addf %6, %8 : vector<1x256xf32>
    %c0_7 = arith.constant 0 : index
    %c0_8 = arith.constant 0 : index
    %c0_9 = arith.constant 0 : index
    %10 = vector.load %arg3[%c0_7, %c0_8, %c0_9] : memref<1x8x256xf32, #tpu.memory_space<vmem>>, vector<1x1x256xf32>
    %11 = vector.shape_cast %10 : vector<1x1x256xf32> to vector<1x256xf32>
    %12 = vector.shape_cast %9 : vector<1x256xf32> to vector<1x1x256xf32>
    tpu.vector_store %arg3[%c0_7, %c0_8, %c0_9], %12 {strides = array<i32>} : memref<1x8x256xf32, #tpu.memory_space<vmem>>, vector<1x1x256xf32>,
    %c0_10 = arith.constant 0 : index
    %c4 = arith.constant 4 : index
    %c0_11 = arith.constant 0 : index
    %13 = vector.load %arg3[%c0_10, %c4, %c0_11] : memref<1x8x256xf32, #tpu.memory_space<vmem>>, vector<1x1x256xf32>
    %14 = vector.shape_cast %13 : vector<1x1x256xf32> to vector<1x256xf32>
    %15 = arith.mulf %4, %4 : vector<8x256xf32>
    %cst_12 = arith.constant dense<0.000000e+00> : vector<256xf32>
    %16 = vector.multi_reduction <add>, %15, %cst_12 [0] : vector<8x256xf32> to vector<256xf32>
    %17 = vector.shape_cast %16 : vector<256xf32> to vector<1x256xf32>
    %18 = arith.addf %14, %17 : vector<1x256xf32>
    %c0_13 = arith.constant 0 : index
    %c4_14 = arith.constant 4 : index
    %c0_15 = arith.constant 0 : index
    %19 = vector.load %arg3[%c0_13, %c4_14, %c0_15] : memref<1x8x256xf32, #tpu.memory_space<vmem>>, vector<1x1x256xf32>
    %20 = vector.shape_cast %19 : vector<1x1x256xf32> to vector<1x256xf32>
    %21 = vector.shape_cast %18 : vector<1x256xf32> to vector<1x1x256xf32>
    tpu.vector_store %arg3[%c0_13, %c4_14, %c0_15], %21 {strides = array<i32>} : memref<1x8x256xf32, #tpu.memory_space<vmem>>, vector<1x1x256xf32>,
    %c0_16 = arith.constant 0 : index
    %c1 = arith.constant 1 : index
    %c0_17 = arith.constant 0 : index
    %c0_18 = arith.constant 0 : index
    %22 = vector.load %arg2[%c0_16, %c1, %c0_17, %c0_18] : memref<1x4x8x256xf32, #tpu.memory_space<vmem>>, vector<1x1x8x256xf32>
    %23 = vector.shape_cast %22 : vector<1x1x8x256xf32> to vector<8x256xf32>
    %c0_19 = arith.constant 0 : index
    %c1_20 = arith.constant 1 : index
    %c0_21 = arith.constant 0 : index
    %24 = vector.load %arg3[%c0_19, %c1_20, %c0_21] : memref<1x8x256xf32, #tpu.memory_space<vmem>>, vector<1x1x256xf32>
    %25 = vector.shape_cast %24 : vector<1x1x256xf32> to vector<1x256xf32>
    %cst_22 = arith.constant dense<0.000000e+00> : vector<256xf32>
    %26 = vector.multi_reduction <add>, %23, %cst_22 [0] : vector<8x256xf32> to vector<256xf32>
    %27 = vector.shape_cast %26 : vector<256xf32> to vector<1x256xf32>
    %28 = arith.addf %25, %27 : vector<1x256xf32>
    %c0_23 = arith.constant 0 : index
    %c1_24 = arith.constant 1 : index
    %c0_25 = arith.constant 0 : index
    %29 = vector.load %arg3[%c0_23, %c1_24, %c0_25] : memref<1x8x256xf32, #tpu.memory_space<vmem>>, vector<1x1x256xf32>
    %30 = vector.shape_cast %29 : vector<1x1x256xf32> to vector<1x256xf32>
    %31 = vector.shape_cast %28 : vector<1x256xf32> to vector<1x1x256xf32>
    tpu.vector_store %arg3[%c0_23, %c1_24, %c0_25], %31 {strides = array<i32>} : memref<1x8x256xf32, #tpu.memory_space<vmem>>, vector<1x1x256xf32>,
    %c0_26 = arith.constant 0 : index
    %c5 = arith.constant 5 : index
    %c0_27 = arith.constant 0 : index
    %32 = vector.load %arg3[%c0_26, %c5, %c0_27] : memref<1x8x256xf32, #tpu.memory_space<vmem>>, vector<1x1x256xf32>
    %33 = vector.shape_cast %32 : vector<1x1x256xf32> to vector<1x256xf32>
    %34 = arith.mulf %23, %23 : vector<8x256xf32>
    %cst_28 = arith.constant dense<0.000000e+00> : vector<256xf32>
    %35 = vector.multi_reduction <add>, %34, %cst_28 [0] : vector<8x256xf32> to vector<256xf32>
    %36 = vector.shape_cast %35 : vector<256xf32> to vector<1x256xf32>
    %37 = arith.addf %33, %36 : vector<1x256xf32>
    %c0_29 = arith.constant 0 : index
    %c5_30 = arith.constant 5 : index
    %c0_31 = arith.constant 0 : index
    %38 = vector.load %arg3[%c0_29, %c5_30, %c0_31] : memref<1x8x256xf32, #tpu.memory_space<vmem>>, vector<1x1x256xf32>
    %39 = vector.shape_cast %38 : vector<1x1x256xf32> to vector<1x256xf32>
    %40 = vector.shape_cast %37 : vector<1x256xf32> to vector<1x1x256xf32>
    tpu.vector_store %arg3[%c0_29, %c5_30, %c0_31], %40 {strides = array<i32>} : memref<1x8x256xf32, #tpu.memory_space<vmem>>, vector<1x1x256xf32>,
    %c0_32 = arith.constant 0 : index
    %c2 = arith.constant 2 : index
    %c0_33 = arith.constant 0 : index
    %c0_34 = arith.constant 0 : index
    %41 = vector.load %arg2[%c0_32, %c2, %c0_33, %c0_34] : memref<1x4x8x256xf32, #tpu.memory_space<vmem>>, vector<1x1x8x256xf32>
    %42 = vector.shape_cast %41 : vector<1x1x8x256xf32> to vector<8x256xf32>
    %c0_35 = arith.constant 0 : index
    %c2_36 = arith.constant 2 : index
    %c0_37 = arith.constant 0 : index
    %43 = vector.load %arg3[%c0_35, %c2_36, %c0_37] : memref<1x8x256xf32, #tpu.memory_space<vmem>>, vector<1x1x256xf32>
    %44 = vector.shape_cast %43 : vector<1x1x256xf32> to vector<1x256xf32>
    %cst_38 = arith.constant dense<0.000000e+00> : vector<256xf32>
    %45 = vector.multi_reduction <add>, %42, %cst_38 [0] : vector<8x256xf32> to vector<256xf32>
    %46 = vector.shape_cast %45 : vector<256xf32> to vector<1x256xf32>
    %47 = arith.addf %44, %46 : vector<1x256xf32>
    %c0_39 = arith.constant 0 : index
    %c2_40 = arith.constant 2 : index
    %c0_41 = arith.constant 0 : index
    %48 = vector.load %arg3[%c0_39, %c2_40, %c0_41] : memref<1x8x256xf32, #tpu.memory_space<vmem>>, vector<1x1x256xf32>
    %49 = vector.shape_cast %48 : vector<1x1x256xf32> to vector<1x256xf32>
    %50 = vector.shape_cast %47 : vector<1x256xf32> to vector<1x1x256xf32>
    tpu.vector_store %arg3[%c0_39, %c2_40, %c0_41], %50 {strides = array<i32>} : memref<1x8x256xf32, #tpu.memory_space<vmem>>, vector<1x1x256xf32>,
    %c0_42 = arith.constant 0 : index
    %c6 = arith.constant 6 : index
    %c0_43 = arith.constant 0 : index
    %51 = vector.load %arg3[%c0_42, %c6, %c0_43] : memref<1x8x256xf32, #tpu.memory_space<vmem>>, vector<1x1x256xf32>
    %52 = vector.shape_cast %51 : vector<1x1x256xf32> to vector<1x256xf32>
    %53 = arith.mulf %42, %42 : vector<8x256xf32>
    %cst_44 = arith.constant dense<0.000000e+00> : vector<256xf32>
    %54 = vector.multi_reduction <add>, %53, %cst_44 [0] : vector<8x256xf32> to vector<256xf32>
    %55 = vector.shape_cast %54 : vector<256xf32> to vector<1x256xf32>
    %56 = arith.addf %52, %55 : vector<1x256xf32>
    %c0_45 = arith.constant 0 : index
    %c6_46 = arith.constant 6 : index
    %c0_47 = arith.constant 0 : index
    %57 = vector.load %arg3[%c0_45, %c6_46, %c0_47] : memref<1x8x256xf32, #tpu.memory_space<vmem>>, vector<1x1x256xf32>
    %58 = vector.shape_cast %57 : vector<1x1x256xf32> to vector<1x256xf32>
    %59 = vector.shape_cast %56 : vector<1x256xf32> to vector<1x1x256xf32>
    tpu.vector_store %arg3[%c0_45, %c6_46, %c0_47], %59 {strides = array<i32>} : memref<1x8x256xf32, #tpu.memory_space<vmem>>, vector<1x1x256xf32>,
    %c0_48 = arith.constant 0 : index
    %c3 = arith.constant 3 : index
    %c0_49 = arith.constant 0 : index
    %c0_50 = arith.constant 0 : index
    %60 = vector.load %arg2[%c0_48, %c3, %c0_49, %c0_50] : memref<1x4x8x256xf32, #tpu.memory_space<vmem>>, vector<1x1x8x256xf32>
    %61 = vector.shape_cast %60 : vector<1x1x8x256xf32> to vector<8x256xf32>
    %c0_51 = arith.constant 0 : index
    %c3_52 = arith.constant 3 : index
    %c0_53 = arith.constant 0 : index
    %62 = vector.load %arg3[%c0_51, %c3_52, %c0_53] : memref<1x8x256xf32, #tpu.memory_space<vmem>>, vector<1x1x256xf32>
    %63 = vector.shape_cast %62 : vector<1x1x256xf32> to vector<1x256xf32>
    %cst_54 = arith.constant dense<0.000000e+00> : vector<256xf32>
    %64 = vector.multi_reduction <add>, %61, %cst_54 [0] : vector<8x256xf32> to vector<256xf32>
    %65 = vector.shape_cast %64 : vector<256xf32> to vector<1x256xf32>
    %66 = arith.addf %63, %65 : vector<1x256xf32>
    %c0_55 = arith.constant 0 : index
    %c3_56 = arith.constant 3 : index
    %c0_57 = arith.constant 0 : index
    %67 = vector.load %arg3[%c0_55, %c3_56, %c0_57] : memref<1x8x256xf32, #tpu.memory_space<vmem>>, vector<1x1x256xf32>
    %68 = vector.shape_cast %67 : vector<1x1x256xf32> to vector<1x256xf32>
    %69 = vector.shape_cast %66 : vector<1x256xf32> to vector<1x1x256xf32>
    tpu.vector_store %arg3[%c0_55, %c3_56, %c0_57], %69 {strides = array<i32>} : memref<1x8x256xf32, #tpu.memory_space<vmem>>, vector<1x1x256xf32>,
    %c0_58 = arith.constant 0 : index
    %c7 = arith.constant 7 : index
    %c0_59 = arith.constant 0 : index
    %70 = vector.load %arg3[%c0_58, %c7, %c0_59] : memref<1x8x256xf32, #tpu.memory_space<vmem>>, vector<1x1x256xf32>
    %71 = vector.shape_cast %70 : vector<1x1x256xf32> to vector<1x256xf32>
    %72 = arith.mulf %61, %61 : vector<8x256xf32>
    %cst_60 = arith.constant dense<0.000000e+00> : vector<256xf32>
    %73 = vector.multi_reduction <add>, %72, %cst_60 [0] : vector<8x256xf32> to vector<256xf32>
    %74 = vector.shape_cast %73 : vector<256xf32> to vector<1x256xf32>
    %75 = arith.addf %71, %74 : vector<1x256xf32>
    %c0_61 = arith.constant 0 : index
    %c7_62 = arith.constant 7 : index
    %c0_63 = arith.constant 0 : index
    %76 = vector.load %arg3[%c0_61, %c7_62, %c0_63] : memref<1x8x256xf32, #tpu.memory_space<vmem>>, vector<1x1x256xf32>
    %77 = vector.shape_cast %76 : vector<1x1x256xf32> to vector<1x256xf32>
    %78 = vector.shape_cast %75 : vector<1x256xf32> to vector<1x1x256xf32>
    tpu.vector_store %arg3[%c0_61, %c7_62, %c0_63], %78 {strides = array<i32>} : memref<1x8x256xf32, #tpu.memory_space<vmem>>, vector<1x1x256xf32>,
    return
  }
  func.func @transform_0(%arg0: i32, %arg1: i32) -> (i32, i32, i32, i32) {
    %c0_i32 = arith.constant 0 : i32
    %c0_i32_0 = arith.constant 0 : i32
    %c0_i32_1 = arith.constant 0 : i32
    return %arg0, %c0_i32, %arg1, %c0_i32_0 : i32, i32, i32, i32
  }
  func.func @transform_1(%arg0: i32, %arg1: i32) -> (i32, i32, i32) {
    %c0_i32 = arith.constant 0 : i32
    %c0_i32_0 = arith.constant 0 : i32
    %c0_i32_1 = arith.constant 0 : i32
    return %arg0, %c0_i32, %c0_i32_0 : i32, i32, i32
  }
}

</mosaic_0001>

<bundles_post_ra>
// kernel: tpu_custom_call.1
= control target key start
LH: loop header
LB: loop body
LE: loop exit
PB: predicated region body
PF: predicated region fallthrough
CT: control target
= control target key end

     0   :  { %6 = vsyncpa [#allocation3], 0  ;;  %s1055_s0 = inlined_call_operand.hbm [shape: f32[2,4,8,256], index: 0, kind: input, shape index: {}]   ;;  %s1056_s1 = inlined_call_operand.hbm [shape: f32[2,8,256], index: 1, kind: output, shape index: {}]  }
   0x1   :  { %8 = vsyncpa [#allocation3 + $0x1], 0 }
   0x2   :  { %9 = vsyncpa [#allocation4], 0 }
   0x3   :  { %11 = vsyncpa [#allocation4 + $0x1], 0  ;;  %s788_s6 = smov 0   ;;  %s790_s7 = smov 0  }
   0x4   :  { %s792_s8 = smov 0   ;;  %s794_s9 = smov 0  }
   0x5   :  { %s796_s10 = smov 0   ;;  %s798_s11 = smov 0  }
   0x6 LB: > { %s555_s12 = sadd.s32 4294967295, %s770_s11   ;;  %s556_s13 = sadd.s32 4294967294, %s770_s11   ;;  %s770_s11 = sphi %s798_s11, %s17_s11   ;;  %s766_s10 = sphi %s796_s10, %s1073_s10   ;;  %s762_s9 = sphi %s794_s9, %s1072_s9   ;;  %s758_s8 = sphi %s792_s8, %s1071_s8   ;;  %s754_s7 = sphi %s790_s7, %s1070_s7   ;;  %s750_s6 = sphi %s788_s6, %s1069_s6  }
   0x7   : > { %s29_s14 = sadd.s32 1, %s766_s10  ;;  %s38_s15 = sadd.s32 1, %s758_s8 }
   0x8   : > { %p31_p0 = scmp.ge.s32.totalorder %s29_s14, 2  ;;  %p45_p1 = scmp.ne.s32.totalorder %s758_s8, %s754_s7 }
   0x9   : > { %p46_p2 = scmp.eq.s32.totalorder %s770_s11, 0  ;;  %p51_p3 = scmp.ne.s32.totalorder %s754_s7, %s750_s6 }
   0xa   : > { %s1075_s14 = smov (%p31_p0, %s29_s14), 0  ;;  %p52_p5 = scmp.eq.s32.totalorder %s555_s12, 0 }
   0xb   : > { %p829_p4 = por %p46_p2, %p45_p1  ;;  %s33_s17 = ssub.s32 %s766_s10, %s1075_s14 }
   0xc   : > { %p75_p6 = scmp.eq.s32.totalorder %s555_s12, 1  ;;  %p36_p7 = scmp.eq.s32.totalorder %s33_s17, 0 }
   0xd   : > { %p835_p8 = por %p52_p5, %p51_p3  ;;  %p81_p10 = scmp.eq.s32.totalorder %s556_s13, 1 }
   0xe   : > { %p839_p9 = por %p75_p6, %p45_p1  ;;  %p604_p13 = scmp.lt.s32.totalorder %s770_s11, 2 }
   0xf   : > { %s844_s20 = scalar_select %p36_p7, %s758_s8, %s38_s15  }
  0x10   : > { %s1060_s19 = scalar_select %p839_p9, 1, 0 }
  0x11   : > { %p846_p11 = por %p81_p10, %p51_p3  ;;  %s101_s22 = sand.u32 1, %s758_s8  }
  0x12   : > { %s559_s23 = sshll.u32 %s101_s22, 6  ;;  %s590_s24 = sshll.u32 %s766_s10, 10 }
  0x13   : > { %s1061_s21 = scalar_select %p846_p11, 1, 0 }
  0x14   : > { %s857_s27 = scalar_lea.hbm %s1055_s0, %s590_s24  ;;  %s105_s28 = scalar_lea.vmem [#allocation2], %s559_s23 }
  0x15   : > { %s114_s29 = sshll.u32 %s105_s28, 4  ;;  %p863_p0 = pnand %p604_p13, %p829_p4  ;;  %s859_s29 = int_to_ptr.vmem [resolvable:$true] %s114_s29 }
  0x16   : > { %s868_s2 = scalar_lea.sflag [#allocation3], %s101_s22  ;;  %s658_s3 = scalar_lea.hbm %s857_s27, 1024 }
  0x17   : > { %p659_p2 = scmp.ne.s32.totalorder %s857_s27, %s658_s3  ;;  %p660_p3 = pneg %p863_p0 }
  0x18   : > { %s663_s12 = scalar_lea.hbm %s1055_s0, 2048  ;;  %p664_p4 = scmp.lt.u32.totalorder %s857_s27, %s1055_s0 }
  0x19   : > { %p661_p5 = pnand %p660_p3, %p659_p2  ;;  %p665_p7 = scmp.lt.u32.totalorder %s663_s12, %s658_s3 }
  0x1a   : > { %p667_p13 = scmp.lt.u32.totalorder %s658_s3, %s857_s27 }
  0x1b   : > { %p662_p6 = pneg %p661_p5  ;;  %p666_p10 = por %p665_p7, %p664_p4 }
  0x1d   : > { %p668_p12 = por %p667_p13, %p666_p10 }
  0x1f   : > { %p669_p1 = pnand %p668_p12, %p662_p6 }
  0x21   : > { %672 = shalt.err (!%p669_p1)
}
  0x22   : > { %s673_s16 = scalar_lea.vmem %s859_s29, 1024  ;;  %s772_s17 = smov [#allocation2]  }
  0x23   : > { %p674_p2 = scmp.ne.s32.totalorder %s859_s29, %s673_s16  ;;  %s678_s22 = sshll.u32 %s772_s17, 4  ;;  %s679_s22 = int_to_ptr.vmem [resolvable:$false] %s678_s22 }
  0x24   : > { %s680_s23 = scalar_lea.vmem %s679_s22, 2048  ;;  %p681_p9 = scmp.lt.s32.totalorder %s859_s29, %s679_s22 }
  0x25   : > { %p676_p5 = pnand %p674_p2, %p660_p3  ;;  %p682_p4 = scmp.lt.s32.totalorder %s680_s23, %s673_s16 }
  0x27   : > { %p677_p11 = pneg %p676_p5  ;;  %p683_p7 = por %p682_p4, %p681_p9 }
  0x29   : > { %p684_p10 = pnand %p683_p7, %p677_p11 }
  0x2b   : > { %687 = shalt.err (!%p684_p10)
}
  0x2c   : > { %s773_s24 = smov 256   ;;  %s774_s25 = smov 16  }
  0x2d   : > { %599 = dma.hbm_to_vmem [thread:$0]  (!%p863_p0), %s857_s27, 1024, %s859_s29, %s868_s2, %s773_s24, %s773_s24, %s774_s25  }
  0x2e   : > { %p122_p12 = scmp.lt.s32.totalorder %s770_s11, 3  ;;  %p1063_p1 = scmp.ge.s32.totalorder %s770_s11, 1 }
  0x30   : > { %p123_p3 = pnand %p1063_p1, %p122_p12 }
  0x31   : > { %s900_s26 = sand.u32 (!%p123_p3), 1, %s754_s7  }
  0x32   : > { %126 = sbr.rel (%p123_p3) target bundleno = 119 (0x77), region = 24  ;;  %s563_s28 = sshll.u32 (!%p123_p3), %s900_s26, 6 }
  0x33   : > { %s129_s3 = scalar_lea.sflag (!%p123_p3), [#allocation3], %s900_s26  ;;  %s904_s4 = scalar_lea.vmem (!%p123_p3), [#allocation2], %s563_s28 }
  0x39   : > { %741 = dma.done.wait (%p835_p8), %s129_s3, 1024  }
  0x3a   : > { %743 = vsyncadd (%p835_p8), %s129_s3, 4294966272  ;;  %s564_s27 = sshll.u32 %s900_s26, 4  ;;  %v178_v0 = vlaneseq  ;;  %v775_v1 = vmov 1966171168   ;;  %v776_v3 = vmov 0.0   ;;  %v157_v6 = vld [vmem:[%s904_s4] sm:$0xff] }
  0x3b   : > { %v176_v2 = vunpack.c.l.s4 %v775_v1  ;;  %s911_s29 = scalar_lea.vmem [#allocation5], %s564_s27  ;;  %v158_v7 = vld [vmem:[%s904_s4 + $0x8] sm:$0xff]  ;;  %v567_v9 = vld [vmem:[%s904_s4 + $0x10] sm:$0xff]  ;;  %v160_v10 = vrot.slane %v157_v6, 4  ;;  %v199_v12 = vmul.f32 %v157_v6, %v157_v6  ;;  %v568_v14 = vld [vmem:[%s904_s4 + $0x18] sm:$0xff]  ;;  %s591_s18 = sshll.u32 %s762_s9, 8 }
  0x3c   : > { %155 = vst [vmem:[%s911_s29] sm:$0xff] %v776_v3  ;;  %156 = vst [vmem:[%s911_s29 + $0x8] sm:$0xff] %v776_v3  ;;  %v179_v5 = vshrl.u32 %v178_v0, 7  ;;  %v166_v11 = vrot.slane %v158_v7, 4  ;;  %v200_v13 = vmul.f32 %v158_v7, %v158_v7  ;;  %v573_v15 = vld [vmem:[%s904_s4 + $0x20] sm:$0xff]  ;;  %v923_v16 = vld [vmem:[%s904_s4 + $0x28] sm:$0xff]  ;;  %v274_v17 = vmul.f32 %v567_v9, %v567_v9  ;;  %s474_s30 = sshll.u32 %s911_s29, 4  ;;  %s1003_s12 = scalar_lea.hbm %s1056_s1, %s591_s18  ;;  %s1005_s30 = int_to_ptr.vmem [resolvable:$true] %s474_s30 }
  0x3d   : > { %v177_v4 = vunpack.c.0.s8 %v176_v2  ;;  %v275_v18 = vmul.f32 %v568_v14, %v568_v14  ;;  %v925_v19 = vmul.f32 %v573_v15, %v573_v15  ;;  %v929_v20 = vmul.f32 %v923_v16, %v923_v16  ;;  %v932_v25 = vld [vmem:[%s904_s4 + $0x30] sm:$0xff]  ;;  %s460_s9 = scalar_lea.sflag [#allocation4], %s900_s26  ;;  %s688_s13 = scalar_lea.vmem %s1005_s30, 256 }
  0x3e   : > { %v161_v21 = vadd.f32 %v160_v10, %v157_v6  ;;  %v167_v22 = vadd.f32 %v166_v11, %v158_v7  ;;  %v201_v23 = vrot.slane %v199_v12, 4  ;;  %v207_v24 = vrot.slane %v200_v13, 4  ;;  %p689_p8 = scmp.ne.s32.totalorder %s1005_s30, %s688_s13  ;;  %p1066_p9 = scmp.ne.s32.totalorder %s1060_s19, 0 }
  0x3f   : > { %v917_v8 = vsub.s32 %v177_v4, %v179_v5  ;;  %v239_v26 = vrot.slane %v567_v9, 4  ;;  %v245_v27 = vrot.slane %v568_v14, 4  ;;  %v276_v28 = vrot.slane %v274_v17, 4  ;;  %s777_s15 = smov [#allocation5]  }
  0x40   : > { %v936_v29 = vmul.f32 %v932_v25, %v932_v25  ;;  %v162_v30 = vrot.slane %v161_v21, 2  ;;  %v168_v31 = vrot.slane %v167_v22, 2  ;;  %v202_v32 = vadd.f32 %v201_v23, %v199_v12  ;;  %p690_p11 = pnand %p689_p8, %p1066_p9  ;;  %s692_s16 = sshll.u32 %s777_s15, 4  ;;  %s693_s16 = int_to_ptr.vmem [resolvable:$false] %s692_s16 }
  0x41   : > { %v208_v33 = vadd.f32 %v207_v24, %v200_v13  ;;  %v240_v34 = vadd.f32 %v567_v9, %v239_v26  ;;  %v246_v35 = vadd.f32 %v568_v14, %v245_v27  ;;  %v277_v36 = vadd.f32 %v276_v28, %v274_v17  ;;  %s694_s17 = scalar_lea.vmem %s693_s16, 512  ;;  %p695_p6 = scmp.lt.s32.totalorder %s1005_s30, %s693_s16 }
  0x42   : > { %v282_v37 = vrot.slane %v275_v18, 4  ;;  %v163_v38 = vadd.f32 %v162_v30, %v161_v21  ;;  %v169_v39 = vadd.f32 %v168_v31, %v167_v22  ;;  %v203_v40 = vrot.slane %v202_v32, 2  ;;  %p691_p0 = pneg %p690_p11  ;;  %p696_p13 = scmp.lt.s32.totalorder %s694_s17, %s688_s13 }
  0x43   : > { %v209_v41 = vrot.slane %v208_v33, 2  ;;  %v241_v42 = vrot.slane %v240_v34, 2  ;;  %v247_v43 = vrot.slane %v246_v35, 2  ;;  %v278_v44 = vrot.slane %v277_v36, 2 }
  0x44   : > { %v283_v45 = vadd.f32 %v282_v37, %v275_v18  ;;  %v164_v46 = vrot.slane %v163_v38, 1  ;;  %v170_v47 = vrot.slane %v169_v39, 1  ;;  %v204_v48 = vadd.f32 %v203_v40, %v202_v32  ;;  %v159_v12 = vld [vmem:[%s911_s29] ss:$8 sm:$0x3]  ;;  %p697_p2 = por %p696_p13, %p695_p6 }
  0x45   : > { %v210_v49 = vadd.f32 %v209_v41, %v208_v33  ;;  %vm938_vm0 = vcmp.lt.s32.totalorder %v178_v0, 256  ;;  %v242_v51 = vadd.f32 %v241_v42, %v240_v34  ;;  %v248_v52 = vadd.f32 %v247_v43, %v246_v35  ;;  %v565_v26 = vld [vmem:[%s911_s29 + $0x4] ss:$8 sm:$0x3] }
  0x46   : > { %v279_v53 = vadd.f32 %v278_v44, %v277_v36  ;;  %v284_v54 = vrot.slane %v283_v45, 2  ;;  %v165_v55 = vadd.f32 %v164_v46, %v163_v38  ;;  %v171_v56 = vadd.f32 %v170_v47, %v169_v39  ;;  %v569_v33 = vld [vmem:[%s911_s29 + $0x1] ss:$8 sm:$0x3]  ;;  %p698_p5 = pnand %p697_p2, %p691_p0 }
  0x47   : > { %v205_v57 = vrot.slane %v204_v48, 1  ;;  %v211_v58 = vrot.slane %v210_v49, 1  ;;  %v243_v59 = vrot.slane %v242_v51, 1  ;;  %v249_v60 = vrot.slane %v248_v52, 1  ;;  %v580_v41 = vld [vmem:[%s904_s4 + $0x38] sm:$0xff] }
  0x48   : > { %v280_v61 = vrot.slane %v279_v53, 1  ;;  %v285_v62 = vadd.f32 %v284_v54, %v283_v45  ;;  %v174_v63 = vcombine.low %v165_v55, %v171_v56  ;;  %v314_v0 = vrot.slane %v573_v15, 4  ;;  %v571_v39 = vld [vmem:[%s911_s29 + $0x5] ss:$8 sm:$0x3] }
  0x49   : > { %v206_v1 = vadd.f32 %v205_v57, %v204_v48  ;;  %v212_v2 = vadd.f32 %v211_v58, %v210_v49  ;;  %v244_v3 = vadd.f32 %v243_v59, %v242_v51  ;;  %v250_v4 = vadd.f32 %v249_v60, %v248_v52 }
  0x4a   : > { %v281_v5 = vadd.f32 %v280_v61, %v279_v53  ;;  %v286_v6 = vrot.slane %v285_v62, 1  ;;  %v181_v7 = vrot.slane %v174_v63, %v917_v8  ;;  %v315_v10 = vadd.f32 %v573_v15, %v314_v0 }
  0x4b   : > { %v215_v9 = vcombine.low %v206_v1, %v212_v2  ;;  %v320_v11 = vrot.slane %v923_v16, 4  ;;  %v253_v13 = vcombine.low %v244_v3, %v250_v4  ;;  %v351_v17 = vrot.slane %v925_v19, 4 }
  0x4c   : > { %v287_v14 = vadd.f32 %v286_v6, %v285_v62  ;;  %v357_v18 = vrot.slane %v929_v20, 4  ;;  %v188_v21 = vrot.slane %v181_v7, %v917_v8  ;;  %v316_v23 = vrot.slane %v315_v10, 2 }
  0x4d   : > { %v222_v22 = vrot.slane %v215_v9, %v917_v8  ;;  %v321_v24 = vadd.f32 %v923_v16, %v320_v11  ;;  %v260_v15 = vrot.slane %v253_v13, %v917_v8  ;;  %v352_v28 = vadd.f32 %v351_v17, %v925_v19  ;;  %v575_v9 = vld [vmem:[%s911_s29 + $0x2] ss:$8 sm:$0x3]  ;;  %v577_v13 = vld [vmem:[%s911_s29 + $0x6] ss:$8 sm:$0x3] }
  0x4e   : > { %v290_v27 = vcombine.low %v281_v5, %v287_v14  ;;  %v358_v30 = vadd.f32 %v357_v18, %v929_v20  ;;  %v190_v31 = vadd.f32 %v188_v21, %v159_v12  ;;  %v317_v34 = vadd.f32 %v316_v23, %v315_v10 }
  0x4f   : > { %v229_v32 = vrot.slane %v222_v22, %v917_v8  ;;  %v322_v35 = vrot.slane %v321_v24, 2  ;;  %v267_v36 = vrot.slane %v260_v15, %v917_v8  ;;  %v353_v37 = vrot.slane %v352_v28, 2 }
  0x50   : > { %v297_v16 = vrot.slane %v290_v27, %v917_v8  ;;  %v359_v38 = vrot.slane %v358_v30, 2  ;;  %195 = vst.msk [vmem:[%s911_s29] ss:$8 sm:$0x3] %vm938_vm0, %v190_v31  ;;  %v318_v20 = vrot.slane %v317_v34, 1  ;;  %v389_v42 = vrot.slane %v932_v25, 4 }
  0x51   : > { %v231_v19 = vadd.f32 %v565_v26, %v229_v32  ;;  %v323_v40 = vadd.f32 %v322_v35, %v321_v24  ;;  %v269_v43 = vadd.f32 %v569_v33, %v267_v36  ;;  %v354_v45 = vadd.f32 %v353_v37, %v352_v28  ;;  %v581_v32 = vld [vmem:[%s911_s29 + $0x3] ss:$8 sm:$0x3] }
  0x52   : > { %v304_v44 = vrot.slane %v297_v16, %v917_v8  ;;  %v360_v46 = vadd.f32 %v359_v38, %v358_v30  ;;  %v319_v47 = vadd.f32 %v318_v20, %v317_v34  ;;  %v390_v49 = vadd.f32 %v932_v25, %v389_v42  ;;  %v583_v16 = vld [vmem:[%s911_s29 + $0x7] ss:$8 sm:$0x3] }
  0x53   : > { %566 = vst.msk [vmem:[%s911_s29 + $0x4] ss:$8 sm:$0x3] %vm938_vm0, %v231_v19  ;;  %v324_v48 = vrot.slane %v323_v40, 1  ;;  %v395_v51 = vrot.slane %v580_v41, 4  ;;  %v355_v53 = vrot.slane %v354_v45, 1  ;;  %v425_v55 = vmul.f32 %v580_v41, %v580_v41 }
  0x54   : > { %570 = vst.msk [vmem:[%s911_s29 + $0x1] ss:$8 sm:$0x3] %vm938_vm0, %v269_v43  ;;  %v306_v52 = vadd.f32 %v571_v39, %v304_v44  ;;  %v361_v54 = vrot.slane %v360_v46, 1  ;;  %v391_v57 = vrot.slane %v390_v49, 2  ;;  %v426_v59 = vrot.slane %v936_v29, 4 }
  0x55   : > { %v325_v56 = vadd.f32 %v324_v48, %v323_v40  ;;  %v396_v58 = vadd.f32 %v580_v41, %v395_v51  ;;  %v356_v60 = vadd.f32 %v355_v53, %v354_v45  ;;  %v432_v25 = vrot.slane %v425_v55, 4 }
  0x56   : > { %572 = vst.msk [vmem:[%s911_s29 + $0x5] ss:$8 sm:$0x3] %vm938_vm0, %v306_v52  ;;  %v362_v61 = vadd.f32 %v361_v54, %v360_v46  ;;  %v392_v63 = vadd.f32 %v391_v57, %v390_v49  ;;  %v427_v2 = vadd.f32 %v426_v59, %v936_v29 }
  0x57   : > { %v328_v62 = vcombine.low %v319_v47, %v325_v56  ;;  %v397_v1 = vrot.slane %v396_v58, 2  ;;  %v433_v3 = vadd.f32 %v432_v25, %v425_v55 }
  0x58   : > { %v365_v0 = vcombine.low %v356_v60, %v362_v61  ;;  %v393_v5 = vrot.slane %v392_v63, 1  ;;  %v428_v7 = vrot.slane %v427_v2, 2 }
  0x59   : > { %v335_v4 = vrot.slane %v328_v62, %v917_v8  ;;  %v398_v6 = vadd.f32 %v397_v1, %v396_v58  ;;  %v434_v11 = vrot.slane %v433_v3, 2 }
  0x5a   : > { %v372_v10 = vrot.slane %v365_v0, %v917_v8  ;;  %v394_v14 = vadd.f32 %v393_v5, %v392_v63  ;;  %v429_v29 = vadd.f32 %v428_v7, %v427_v2 }
  0x5b   : > { %v342_v12 = vrot.slane %v335_v4, %v917_v8  ;;  %v399_v17 = vrot.slane %v398_v6, 1  ;;  %v435_v21 = vadd.f32 %v434_v11, %v433_v3 }
  0x5c   : > { %v379_v18 = vrot.slane %v372_v10, %v917_v8  ;;  %v430_v24 = vrot.slane %v429_v29, 1 }
  0x5d   : > { %v344_v22 = vadd.f32 %v575_v9, %v342_v12  ;;  %v400_v23 = vadd.f32 %v399_v17, %v398_v6  ;;  %v436_v15 = vrot.slane %v435_v21, 1 }
  0x5e   : > { %v381_v26 = vadd.f32 %v577_v13, %v379_v18  ;;  %v431_v28 = vadd.f32 %v430_v24, %v429_v29 }
  0x5f   : > { %576 = vst.msk [vmem:[%s911_s29 + $0x2] ss:$8 sm:$0x3] %vm938_vm0, %v344_v22  ;;  %v403_v27 = vcombine.low %v394_v14, %v400_v23  ;;  %v437_v30 = vadd.f32 %v436_v15, %v435_v21 }
  0x60   : > { %578 = vst.msk [vmem:[%s911_s29 + $0x6] ss:$8 sm:$0x3] %vm938_vm0, %v381_v26 }
  0x61   : > { %v410_v31 = vrot.slane %v403_v27, %v917_v8  ;;  %v440_v33 = vcombine.low %v431_v28, %v437_v30 }
  0x63   : > { %v417_v34 = vrot.slane %v410_v31, %v917_v8  ;;  %v447_v35 = vrot.slane %v440_v33, %v917_v8 }
  0x65   : > { %v419_v36 = vadd.f32 %v581_v32, %v417_v34  ;;  %v454_v37 = vrot.slane %v447_v35, %v917_v8 }
  0x67   : > { %582 = vst.msk [vmem:[%s911_s29 + $0x3] ss:$8 sm:$0x3] %vm938_vm0, %v419_v36  ;;  %v456_v38 = vadd.f32 %v583_v16, %v454_v37 }
  0x69   : > { %584 = vst.msk [vmem:[%s911_s29 + $0x7] ss:$8 sm:$0x3] %vm938_vm0, %v456_v38 }
  0x6a   : > { %701 = shalt.err (!%p698_p5)
}
  0x6b   : > { %s702_s22 = scalar_lea.hbm %s1003_s12, 256  ;;  %s706_s25 = scalar_lea.hbm %s1056_s1, 512 }
  0x6c   : > { %p703_p4 = scmp.ne.s32.totalorder %s1003_s12, %s702_s22  ;;  %p707_p12 = scmp.lt.u32.totalorder %s1003_s12, %s1056_s1 }
  0x6d   : > { %p708_p1 = scmp.lt.u32.totalorder %s706_s25, %s702_s22  ;;  %p710_p8 = scmp.lt.u32.totalorder %s702_s22, %s1003_s12 }
  0x6e   : > { %p704_p7 = pnand %p703_p4, %p1066_p9 }
  0x6f   : > { %p709_p3 = por %p708_p1, %p707_p12 }
  0x70   : > { %p705_p10 = pneg %p704_p7 }
  0x71   : > { %p711_p11 = por %p710_p8, %p709_p3 }
  0x73   : > { %p712_p0 = pnand %p711_p11, %p705_p10 }
  0x75   : > { %715 = shalt.err (!%p712_p0)
}
  0x76   : > { %594 = dma.vmem_to_hbm [thread:$0]  (%p1066_p9), %s1005_s30, 256, %s1003_s12, %s460_s9  }
  0x77 PF: > { %s486_s3 = sand.u32 1, %s750_s6   ;;  %p1067_p6 = scmp.ne.s32.totalorder %s1061_s21, 0 }
  0x78   : > { %p1068_p13 = scmp.ge.s32.totalorder %s770_s11, 2  ;;  %s487_s4 = scalar_lea.sflag [#allocation4], %s486_s3 }
  0x7a   : > { %p601_p2 = pnand %p1068_p13, %p1067_p6 }
  0x7c   : > { %745 = dma.done.wait (!%p601_p2), %s487_s4, 256  }
  0x7d   : > { %747 = vsyncadd (!%p601_p2), %s487_s4, 4294967040  ;;  %s17_s11 = sadd.s32 1, %s770_s11   ;;  %s1069_s6 = smov %s754_s7 }
  0x7e   : > { %p14_p5 = scmp.ge.s32.totalorder %s17_s11, 4   ;;  %s1070_s7 = smov %s758_s8 }
  0x7f   : > { %s1071_s8 = smov %s844_s20  ;;  %s1072_s9 = smov %s766_s10 }
  0x80   : > { %s1073_s10 = smov %s1075_s14  ;;  %16 = sbr.rel (!%p14_p5) target bundleno = 6 (0x6), region = 83 }
  0x87   :  { %492 = vsyncpa [#allocation3], 1 }
  0x88   :  { %494 = vsyncpa [#allocation3 + $0x1], 1 }
  0x89   :  { %495 = vsyncpa [#allocation4], 1 }
  0x8a   :  { %497 = vsyncpa [#allocation4 + $0x1], 1 }

</bundles_post_ra>
